<compile_context>
chip_gen: v6e
topology: v6e:2x2x1
jax: 0.10.0
libtpu: 0.0.40
codegen_flags: <defaults>
</compile_context>

<pallas_src>
import functools
import math

import jax
import jax.numpy as jnp
from jax.experimental import pallas as pl
from jax.experimental.pallas import tpu as pltpu


# ------------------------------- Pallas kernel ------------------------------

def lm_head_kernel(x_ref, wt_ref, bt_ref, lnw_ref, lnb_ref, wd_ref, bd_ref,
                   out_ref, h_scratch, *, eps):
    # Compute the transform (dense -> gelu -> LayerNorm) once per row tile,
    # i.e. only on the first vocab step; reuse the VMEM scratch afterwards.
    @pl.when(pl.program_id(1) == 0)
    def _():
        x = x_ref[...]                                            # (tm, D)
        h = jnp.dot(x, wt_ref[...],
                    preferred_element_type=jnp.float32) + bt_ref[...]
        # erf-based gelu, identical to the reference implementation.
        h = h * 0.5 * (1.0 + jax.lax.erf(h / math.sqrt(2.0)))
        u = jnp.mean(h, axis=-1, keepdims=True)
        s = jnp.mean((h - u) ** 2, axis=-1, keepdims=True)
        h = lnw_ref[...] * ((h - u) * jax.lax.rsqrt(s + eps)) + lnb_ref[...]
        h_scratch[...] = h

    # Decoder projection for this vocab tile: (tm, D) @ (D, tv) + (1, tv).
    out_ref[...] = (jnp.dot(h_scratch[...], wd_ref[...],
                            preferred_element_type=jnp.float32)
                    + bd_ref[...]).astype(out_ref.dtype)


# ------------------------------ Python wrapper -------------------------------

def _round_up(a, b):
    return (a + b - 1) // b * b


def bert_lm_prediction_head(hidden_states, params, *, eps=1e-12,
                            tm=None, tv=None):
    """hidden_states: (N, L, D) -> logits (N, L, V)."""
    n, l, d = hidden_states.shape
    v = params["wd"].shape[1]
    m = n * l

    # Tile sizes: rows in multiples of 8, vocab in multiples of 128
    # (lane-dense output).  Use the biggest tiles that stay comfortably
    # inside VMEM at these shapes.
    tm = tm if tm is not None else min(512, _round_up(m, 8))
    tv = tv if tv is not None else min(256, _round_up(v, 128))

    m_pad = _round_up(m, tm)
    v_pad = _round_up(v, tv)

    x2d = hidden_states.reshape(m, d)
    if m_pad != m:
        x2d = jnp.pad(x2d, ((0, m_pad - m), (0, 0)))
    wd, bd = params["wd"], params["bd"]
    if v_pad != v:
        wd = jnp.pad(wd, ((0, 0), (0, v_pad - v)))
        bd = jnp.pad(bd, ((0, 0), (0, v_pad - v)))

    grid = (m_pad // tm, v_pad // tv)
    kernel = functools.partial(lm_head_kernel, eps=eps)

    out2d = pl.pallas_call(
        kernel,
        out_shape=jax.ShapeDtypeStruct((m_pad, v_pad), hidden_states.dtype),
        grid_spec=pltpu.PrefetchScalarGridSpec(
            num_scalar_prefetch=0,
            grid=grid,
            in_specs=[
                pl.BlockSpec((tm, d), lambda i, j: (i, 0)),   # x rows
                pl.BlockSpec((d, d), lambda i, j: (0, 0)),    # transform W
                pl.BlockSpec((1, d), lambda i, j: (0, 0)),    # transform b
                pl.BlockSpec((1, d), lambda i, j: (0, 0)),    # LN weight
                pl.BlockSpec((1, d), lambda i, j: (0, 0)),    # LN bias
                pl.BlockSpec((d, tv), lambda i, j: (0, j)),   # decoder W tile
                pl.BlockSpec((1, tv), lambda i, j: (0, j)),   # decoder bias tile
            ],
            out_specs=pl.BlockSpec((tm, tv), lambda i, j: (i, j)),
            scratch_shapes=[pltpu.VMEM((tm, d), jnp.float32)],
        ),
        compiler_params=pltpu.CompilerParams(
            dimension_semantics=("parallel", "arbitrary")),
    )(x2d, params["wt"], params["bt"], params["lnw"], params["lnb"], wd, bd)

    return out2d[:m, :v].reshape(n, l, v)


# --------------------------- plain-JAX reference -----------------------------

def reference_lm_head(x, p, eps=1e-12):
    h = x @ p["wt"] + p["bt"][0]
    h = h * 0.5 * (1.0 + jax.lax.erf(h / math.sqrt(2.0)))
    u = h.mean(-1, keepdims=True)
    s = ((h - u) ** 2).mean(-1, keepdims=True)
    h = p["lnw"][0] * ((h - u) / jnp.sqrt(s + eps)) + p["lnb"][0]
    return h @ p["wd"] + p["bd"][0]


# ----------------------------------- main ------------------------------------

if __name__ == "__main__":
    # Small config consistent with the module: (N, L, D) hidden states,
    # vocab a multiple of 128 so decoder tiles are lane-dense.
    N, L, D, V = 2, 8, 32, 512

    key = jax.random.PRNGKey(0)
    kx, kw1, kw2 = jax.random.split(key, 3)

    hidden_states = jax.random.normal(kx, (N, L, D), jnp.float32)

    params = dict(
        wt=jax.random.normal(kw1, (D, D), jnp.float32) * 0.02,   # transform dense
        bt=jnp.zeros((1, D), jnp.float32),
        lnw=jnp.ones((1, D), jnp.float32),                       # LayerNorm gamma
        lnb=jnp.zeros((1, D), jnp.float32),                      # LayerNorm beta
        wd=jax.random.normal(kw2, (D, V), jnp.float32) * 0.02,   # decoder (no bias in Linear)
        bd=jnp.zeros((1, V), jnp.float32),                       # separate self.bias
    )

    logits = bert_lm_prediction_head(hidden_states, params)
    jax.block_until_ready(logits)

    assert logits.shape == (N, L, V)

    ref = reference_lm_head(hidden_states, params)
    assert jnp.allclose(logits, ref, atol=1e-4, rtol=1e-4), (
        float(jnp.max(jnp.abs(logits - ref))))

    print("KERNEL_OK")
</pallas_src>

<mosaic_0001>
module attributes {stable_mosaic.version = 11 : i64} {
  func.func @lm_head_kernel(%arg0: i32, %arg1: i32, %arg2: memref<16x32xf32, #tpu.memory_space<vmem>>, %arg3: memref<32x32xf32, #tpu.memory_space<vmem>>, %arg4: memref<1x32xf32, #tpu.memory_space<vmem>>, %arg5: memref<1x32xf32, #tpu.memory_space<vmem>>, %arg6: memref<1x32xf32, #tpu.memory_space<vmem>>, %arg7: memref<32x256xf32, #tpu.memory_space<vmem>>, %arg8: memref<1x256xf32, #tpu.memory_space<vmem>>, %arg9: memref<16x256xf32, #tpu.memory_space<vmem>>, %arg10: memref<16x32xf32, #tpu.memory_space<vmem>>) attributes {dimension_semantics = [#tpu.dimension_semantics<parallel>, #tpu.dimension_semantics<arbitrary>], iteration_bounds = array<i64: 1, 2>, scalar_prefetch = 0 : i64, scratch_operands = 1 : i64, tpu.core_type = #tpu.core_type<tc>, window_params = [{transform_indices = @transform_0, window_bounds = array<i64: 16, 32>}, {pipeline_mode = #tpu.pipeline_mode<synchronous>, transform_indices = @transform_1, window_bounds = array<i64: 32, 32>}, {pipeline_mode = #tpu.pipeline_mode<synchronous>, transform_indices = @transform_2, window_bounds = array<i64: 1, 32>}, {pipeline_mode = #tpu.pipeline_mode<synchronous>, transform_indices = @transform_3, window_bounds = array<i64: 1, 32>}, {pipeline_mode = #tpu.pipeline_mode<synchronous>, transform_indices = @transform_4, window_bounds = array<i64: 1, 32>}, {transform_indices = @transform_5, window_bounds = array<i64: 32, 256>}, {transform_indices = @transform_6, window_bounds = array<i64: 1, 256>}, {transform_indices = @transform_7, window_bounds = array<i64: 16, 256>}]} {
    %c0_i32 = arith.constant 0 : i32
    %0 = arith.cmpi eq, %arg1, %c0_i32 : i32
    %1 = arith.extui %0 : i1 to i32
    %c0_i32_0 = arith.constant 0 : i32
    %2 = arith.cmpi ne, %1, %c0_i32_0 : i32
    scf.if %2 {
      %c0_8 = arith.constant 0 : index
      %c0_9 = arith.constant 0 : index
      %10 = vector.load %arg2[%c0_8, %c0_9] : memref<16x32xf32, #tpu.memory_space<vmem>>, vector<16x32xf32>
      %c0_10 = arith.constant 0 : index
      %c0_11 = arith.constant 0 : index
      %11 = vector.load %arg3[%c0_10, %c0_11] : memref<32x32xf32, #tpu.memory_space<vmem>>, vector<32x32xf32>
      %cst_12 = arith.constant dense<0.000000e+00> : vector<16x32xf32>
      %12 = tpu.matmul %10, %11, %cst_12 {dimension_numbers = #tpu.dot_dimension_numbers<[1], [0], [0], [1], [0, 0, 1, 1], [], []>} : vector<16x32xf32>, vector<32x32xf32>, vector<16x32xf32> -> vector<16x32xf32>
      %c0_13 = arith.constant 0 : index
      %c0_14 = arith.constant 0 : index
      %13 = vector.load %arg4[%c0_13, %c0_14] : memref<1x32xf32, #tpu.memory_space<vmem>>, vector<1x32xf32>
      %14 = vector.broadcast %13 : vector<1x32xf32> to vector<16x32xf32>
      %15 = arith.addf %12, %14 : vector<16x32xf32>
      %cst_15 = arith.constant 5.000000e-01 : f32
      %16 = vector.broadcast %cst_15 : f32 to vector<16x32xf32>
      %17 = arith.mulf %15, %16 : vector<16x32xf32>
      %cst_16 = arith.constant 1.41421354 : f32
      %18 = vector.broadcast %cst_16 : f32 to vector<16x32xf32>
      %19 = arith.divf %15, %18 : vector<16x32xf32>
      %20 = math.erf %19 : vector<16x32xf32>
      %cst_17 = arith.constant 1.000000e+00 : f32
      %21 = vector.broadcast %cst_17 : f32 to vector<16x32xf32>
      %22 = arith.addf %21, %20 : vector<16x32xf32>
      %23 = arith.mulf %17, %22 : vector<16x32xf32>
      %cst_18 = arith.constant dense<0.000000e+00> : vector<16xf32>
      %24 = vector.multi_reduction <add>, %23, %cst_18 [1] : vector<16x32xf32> to vector<16xf32>
      %25 = vector.shape_cast %24 : vector<16xf32> to vector<16x1xf32>
      %cst_19 = arith.constant 3.200000e+01 : f32
      %26 = vector.broadcast %cst_19 : f32 to vector<16x1xf32>
      %27 = arith.divf %25, %26 : vector<16x1xf32>
      %28 = vector.broadcast %27 : vector<16x1xf32> to vector<16x32xf32>
      %29 = arith.subf %23, %28 : vector<16x32xf32>
      %30 = arith.mulf %29, %29 : vector<16x32xf32>
      %cst_20 = arith.constant dense<0.000000e+00> : vector<16xf32>
      %31 = vector.multi_reduction <add>, %30, %cst_20 [1] : vector<16x32xf32> to vector<16xf32>
      %32 = vector.shape_cast %31 : vector<16xf32> to vector<16x1xf32>
      %cst_21 = arith.constant 3.200000e+01 : f32
      %33 = vector.broadcast %cst_21 : f32 to vector<16x1xf32>
      %34 = arith.divf %32, %33 : vector<16x1xf32>
      %c0_22 = arith.constant 0 : index
      %c0_23 = arith.constant 0 : index
      %35 = vector.load %arg5[%c0_22, %c0_23] : memref<1x32xf32, #tpu.memory_space<vmem>>, vector<1x32xf32>
      %36 = vector.broadcast %27 : vector<16x1xf32> to vector<16x32xf32>
      %37 = arith.subf %23, %36 : vector<16x32xf32>
      %cst_24 = arith.constant 9.99999996E-13 : f32
      %38 = vector.broadcast %cst_24 : f32 to vector<16x1xf32>
      %39 = arith.addf %34, %38 : vector<16x1xf32>
      %40 = math.rsqrt %39 : vector<16x1xf32>
      %41 = vector.broadcast %40 : vector<16x1xf32> to vector<16x32xf32>
      %42 = arith.mulf %37, %41 : vector<16x32xf32>
      %43 = vector.broadcast %35 : vector<1x32xf32> to vector<16x32xf32>
      %44 = arith.mulf %43, %42 : vector<16x32xf32>
      %c0_25 = arith.constant 0 : index
      %c0_26 = arith.constant 0 : index
      %45 = vector.load %arg6[%c0_25, %c0_26] : memref<1x32xf32, #tpu.memory_space<vmem>>, vector<1x32xf32>
      %46 = vector.broadcast %45 : vector<1x32xf32> to vector<16x32xf32>
      %47 = arith.addf %44, %46 : vector<16x32xf32>
      %c0_27 = arith.constant 0 : index
      %c0_28 = arith.constant 0 : index
      %48 = vector.load %arg10[%c0_27, %c0_28] : memref<16x32xf32, #tpu.memory_space<vmem>>, vector<16x32xf32>
      tpu.vector_store %arg10[%c0_27, %c0_28], %47 {strides = array<i32>} : memref<16x32xf32, #tpu.memory_space<vmem>>, vector<16x32xf32>,
    } else {
    }
    %c0 = arith.constant 0 : index
    %c0_1 = arith.constant 0 : index
    %3 = vector.load %arg10[%c0, %c0_1] : memref<16x32xf32, #tpu.memory_space<vmem>>, vector<16x32xf32>
    %c0_2 = arith.constant 0 : index
    %c0_3 = arith.constant 0 : index
    %4 = vector.load %arg7[%c0_2, %c0_3] : memref<32x256xf32, #tpu.memory_space<vmem>>, vector<32x256xf32>
    %cst = arith.constant dense<0.000000e+00> : vector<16x256xf32>
    %5 = tpu.matmul %3, %4, %cst {dimension_numbers = #tpu.dot_dimension_numbers<[1], [0], [0], [1], [0, 0, 1, 1], [], []>} : vector<16x32xf32>, vector<32x256xf32>, vector<16x256xf32> -> vector<16x256xf32>
    %c0_4 = arith.constant 0 : index
    %c0_5 = arith.constant 0 : index
    %6 = vector.load %arg8[%c0_4, %c0_5] : memref<1x256xf32, #tpu.memory_space<vmem>>, vector<1x256xf32>
    %7 = vector.broadcast %6 : vector<1x256xf32> to vector<16x256xf32>
    %8 = arith.addf %5, %7 : vector<16x256xf32>
    %c0_6 = arith.constant 0 : index
    %c0_7 = arith.constant 0 : index
    %9 = vector.load %arg9[%c0_6, %c0_7] : memref<16x256xf32, #tpu.memory_space<vmem>>, vector<16x256xf32>
    tpu.vector_store %arg9[%c0_6, %c0_7], %8 {strides = array<i32>} : memref<16x256xf32, #tpu.memory_space<vmem>>, vector<16x256xf32>,
    return
  }
  func.func @transform_0(%arg0: i32, %arg1: i32) -> (i32, i32) {
    %c0_i32 = arith.constant 0 : i32
    %c0_i32_0 = arith.constant 0 : i32
    return %arg0, %c0_i32 : i32, i32
  }
  func.func @transform_1(%arg0: i32, %arg1: i32) -> (i32, i32) {
    %c0_i32 = arith.constant 0 : i32
    %c0_i32_0 = arith.constant 0 : i32
    %c0_i32_1 = arith.constant 0 : i32
    return %c0_i32, %c0_i32_0 : i32, i32
  }
  func.func @transform_2(%arg0: i32, %arg1: i32) -> (i32, i32) {
    %c0_i32 = arith.constant 0 : i32
    %c0_i32_0 = arith.constant 0 : i32
    %c0_i32_1 = arith.constant 0 : i32
    return %c0_i32, %c0_i32_0 : i32, i32
  }
  func.func @transform_3(%arg0: i32, %arg1: i32) -> (i32, i32) {
    %c0_i32 = arith.constant 0 : i32
    %c0_i32_0 = arith.constant 0 : i32
    %c0_i32_1 = arith.constant 0 : i32
    return %c0_i32, %c0_i32_0 : i32, i32
  }
  func.func @transform_4(%arg0: i32, %arg1: i32) -> (i32, i32) {
    %c0_i32 = arith.constant 0 : i32
    %c0_i32_0 = arith.constant 0 : i32
    %c0_i32_1 = arith.constant 0 : i32
    return %c0_i32, %c0_i32_0 : i32, i32
  }
  func.func @transform_5(%arg0: i32, %arg1: i32) -> (i32, i32) {
    %c0_i32 = arith.constant 0 : i32
    %c0_i32_0 = arith.constant 0 : i32
    return %c0_i32, %arg1 : i32, i32
  }
  func.func @transform_6(%arg0: i32, %arg1: i32) -> (i32, i32) {
    %c0_i32 = arith.constant 0 : i32
    %c0_i32_0 = arith.constant 0 : i32
    return %c0_i32, %arg1 : i32, i32
  }
  func.func @transform_7(%arg0: i32, %arg1: i32) -> (i32, i32) {
    %c0_i32 = arith.constant 0 : i32
    return %arg0, %arg1 : i32, i32
  }
}

</mosaic_0001>

<bundles_post_ra>
// kernel: tpu_custom_call.1
= control target key start
LH: loop header
LB: loop body
LE: loop exit
PB: predicated region body
PF: predicated region fallthrough
CT: control target
= control target key end

     0   :  { %s1389_s0 = inlined_call_operand.hbm [shape: f32[16,32], index: 0, kind: input, shape index: {}]   ;;  %s1390_s1 = inlined_call_operand.hbm [shape: f32[32,32], index: 1, kind: input, shape index: {}]   ;;  %s1391_s2 = inlined_call_operand.vmem [shape: f32[1,32], index: 2, kind: input, shape index: {}]   ;;  %s1392_s3 = inlined_call_operand.vmem [shape: f32[1,32], index: 3, kind: input, shape index: {}]   ;;  %s1393_s4 = inlined_call_operand.vmem [shape: f32[1,32], index: 4, kind: input, shape index: {}]   ;;  %s1394_s5 = inlined_call_operand.hbm [shape: f32[32,512], index: 5, kind: input, shape index: {}]   ;;  %s1395_s6 = inlined_call_operand.vmem [shape: f32[1,512], index: 6, kind: input, shape index: {}]   ;;  %s1396_s7 = inlined_call_operand.hbm [shape: f32[16,512], index: 7, kind: output, shape index: {}]  }
   0x1   :  { %1404 = sst [smem:[#allocation17_spill]] %s1389_s0 }
   0x2   :  { %1405 = sst [smem:[#allocation18_spill]] %s1390_s1 }
   0x3   :  { %12 = vsyncpa [#allocation4], 0 }
   0x4   :  { %13 = vsyncpa [#allocation7], 0 }
   0x5   :  { %14 = vsyncpa [#allocation5], 0 }
   0x6   :  { %16 = vsyncpa [#allocation5 + $0x1], 0  ;;  %s1145_s24 = smov 0   ;;  %s1147_s25 = smov 0  }
   0x7   :  { %s1149_s26 = smov 0   ;;  %s1151_s27 = smov 0  }
   0x8   :  { %s1153_s28 = smov 0   ;;  %s1155_s29 = smov 0  }
   0x9 LB: > { %1406 = sst [smem:[#allocation14_spill]] %s1070_s24  ;;  %s1176_s30 = sadd.s32 4294967295, %s1090_s29   ;;  %s1090_s29 = sphi %s1155_s29, %s22_s29   ;;  %s1086_s28 = sphi %s1153_s28, %s1434_s28   ;;  %s1082_s27 = sphi %s1151_s27, %s1433_s27   ;;  %s1078_s26 = sphi %s1149_s26, %s1432_s26   ;;  %s1074_s25 = sphi %s1147_s25, %s1431_s25   ;;  %s1070_s24 = sphi %s1145_s24, %s1430_s24  }
   0xa   : > { %1407 = sst [smem:[#allocation15_spill]] %s1090_s29  ;;  %s768_s8 = sadd.s32 4294967294, %s1090_s29  }
   0xb   : > { %p158_p0 = scmp.ne.s32.totalorder %s1078_s26, %s1074_s25  ;;  %p159_p1 = scmp.eq.s32.totalorder %s1090_s29, 0 }
   0xc   : > { %p164_p2 = scmp.ne.s32.totalorder %s1074_s25, %s1070_s24  ;;  %p1397_p3 = scmp.eq.s32.totalorder %s1176_s30, 0 }
   0xd   : > { %p216_p4 = scmp.eq.s32.totalorder %s1176_s30, 1  ;;  %p1187_p5 = por %p159_p1, %p158_p0 }
   0xe   : > { %p222_p6 = scmp.eq.s32.totalorder %s768_s8, 1  ;;  %p1193_p7 = por %p1397_p3, %p164_p2 }
   0xf   : > { %p1197_p8 = por %p216_p4, %p158_p0  ;;  %p769_p10 = scmp.ge.s32.totalorder %s1090_s29, 1 }
  0x10   : > { %s1409_s11 = scalar_select %p1193_p7, 1, 0 }
  0x11   : > { %s1410_s12 = scalar_select %p1197_p8, 1, 0 }
  0x12   : > { %p1201_p9 = por %p222_p6, %p164_p2  ;;  %p229_p11 = scmp.lt.s32.totalorder %s1090_s29, 3 }
  0x13   : > { %s1092_s15 = smov [#allocation3]   ;;  %p851_p1 = scmp.lt.s32.totalorder %s1090_s29, 2 }
  0x14   : > { %s1411_s13 = scalar_select %p1201_p9, 1, 0 }
  0x15   : > { %p1207_p12 = pnand %p769_p10, %p229_p11  ;;  %s244_s16 = sshll.u32 %s1092_s15, 4  ;;  %s245_s16 = int_to_ptr.vmem [resolvable:$true] %s244_s16 }
  0x16   : > { %1412 = sst [smem:[#allocation16_spill]] %s1411_s13  ;;  %s1093_s18 = smov [#allocation6]  }
  0x17   : > { %p834_p13 = pneg %p1207_p12  ;;  %s257_s19 = sshll.u32 %s1093_s18, 4  ;;  %s258_s19 = int_to_ptr.vmem [resolvable:$true] %s257_s19 }
  0x18   : > { %p1223_p2 = pnand %p851_p1, %p1187_p5  ;;  %s933_s21 = scalar_lea.vmem %s245_s16, 256 }
  0x19   : > { %p1217_p4 = pnand %p834_p13, %p1397_p3  ;;  %p934_p10 = scmp.ne.s32.totalorder %s245_s16, %s933_s21 }
  0x1a   : > { %p941_p0 = scmp.lt.s32.totalorder %s245_s16, %s245_s16  ;;  %p942_p3 = scmp.lt.s32.totalorder %s933_s21, %s933_s21 }
  0x1b   : > { %p924_p6 = pneg %p1217_p4 }
  0x1c   : > { %p943_p9 = por %p942_p3, %p941_p0 }
  0x1d   : > { %p936_p11 = pnand %p934_p10, %p924_p6 }
  0x1f   : > { %p937_p13 = pneg %p936_p11 }
  0x21   : > { %p944_p8 = pnand %p943_p9, %p937_p13 }
  0x23   : > { %947 = shalt.err (!%p944_p8)
}
  0x24   : > { %s1094_s22 = smov 128   ;;  %s1095_s23 = smov 8  }
  0x25   : > { %s1416_s0 = sld [smem:[#allocation17_spill]]  ;;  %s959_s15 = scalar_lea.vmem %s258_s19, 512 }
  0x26   : > { %p960_p5 = scmp.ne.s32.totalorder %s258_s19, %s959_s15  ;;  %p967_p11 = scmp.lt.s32.totalorder %s258_s19, %s258_s19 }
  0x27   : > { %p968_p7 = scmp.lt.s32.totalorder %s959_s15, %s959_s15 }
  0x28   : > { %p962_p1 = pnand %p960_p5, %p924_p6 }
  0x29   : > { %p969_p3 = por %p968_p7, %p967_p11 }
  0x2a   : > { %p963_p10 = pneg %p962_p1 }
  0x2b   : > { %837 = dma.hbm_to_vmem [thread:$0]  (!%p1217_p4), %s1416_s0, 256, %s245_s16, [#allocation4], %s1094_s22, %s1094_s22, %s1095_s23  }
  0x2c   : > { %p970_p9 = pnand %p969_p3, %p963_p10 }
  0x2e   : > { %973 = shalt.err (!%p970_p9)
}
  0x2f   : > { %s1417_s1 = sld [smem:[#allocation18_spill]]  ;;  %s31_s16 = sadd.s32 1, %s1086_s28 }
  0x30   : > { %s280_s8 = sand.u32 1, %s1090_s29   ;;  %p32_p8 = scmp.ge.s32.totalorder %s31_s16, 2 }
  0x31   : > { %s282_s10 = sand.u32 1, %s1078_s26   ;;  %s795_s15 = sshll.u32 %s1086_s28, 8 }
  0x32   : > { %s1436_s16 = smov (%p32_p8, %s31_s16), 0  ;;  %s773_s17 = sshll.u32 %s282_s10, 6 }
  0x33   : > { %s1254_s21 = scalar_lea.hbm %s1394_s5, %s795_s15  ;;  %s148_s0 = ssub.s32 %s1086_s28, %s1436_s16 }
  0x34   : > { %p149_p7 = scmp.eq.s32.totalorder %s148_s0, 0  ;;  %s284_s13 = scalar_lea.vmem [#allocation8], %s773_s17 }
  0x35   : > { %840 = dma.hbm_to_vmem [thread:$0]  (!%p1217_p4), %s1417_s1, 512, %s258_s19, [#allocation7], %s1094_s22, %s1094_s22, %s1095_s23  }
  0x36   : > { %s291_s24 = sshll.u32 %s284_s13, 4  ;;  %s1418_s19 = sadd.s32 1, %s1078_s26  ;;  %s292_s24 = int_to_ptr.vmem [resolvable:$true] %s291_s24 }
  0x37   : > { %s1261_s22 = scalar_select %p149_p7, %s1078_s26, %s1418_s19  }
  0x38   : > { %s281_s23 = scalar_lea.sflag [#allocation4], %s280_s8  ;;  %p976_p0 = pneg %p1223_p2 }
  0x39   : > { %s987_s1 = scalar_lea.vmem %s292_s24, 1024  ;;  %s1096_s10 = smov [#allocation8]  }
  0x3a   : > { %p988_p4 = scmp.ne.s32.totalorder %s292_s24, %s987_s1  ;;  %s992_s29 = sshll.u32 %s1096_s10, 4  ;;  %s993_s29 = int_to_ptr.vmem [resolvable:$false] %s992_s29 }
  0x3b   : > { %s994_s9 = scalar_lea.vmem %s993_s29, 2048  ;;  %p995_p5 = scmp.lt.s32.totalorder %s292_s24, %s993_s29 }
  0x3c   : > { %p990_p6 = pnand %p988_p4, %p976_p0  ;;  %p996_p1 = scmp.lt.s32.totalorder %s994_s9, %s987_s1 }
  0x3e   : > { %p991_p13 = pneg %p990_p6  ;;  %p997_p10 = por %p996_p1, %p995_p5 }
  0x40   : > { %p998_p11 = pnand %p997_p10, %p991_p13 }
  0x42   : > { %1001 = shalt.err (!%p998_p11)
}
  0x43   : > { %s1097_s0 = smov 512   ;;  %s1098_s13 = smov 256  }
  0x44   : > { %s1099_s8 = smov 16   ;;  %311 = sbr.rel (%p1207_p12) target bundleno = 852 (0x354), region = 48 }
  0x45   : > { %844 = dma.hbm_to_vmem [thread:$0]  (!%p1223_p2), %s1254_s21, 1024, %s292_s24, %s281_s23, %s1097_s0, %s1098_s13, %s1099_s8  }
  0x46   : > { %p1419_p3 = scmp.eq.s32.totalorder (!%p1207_p12), %s1176_s30, 0 }
  0x49   : > { %1053 = dma.done.wait (%p1419_p3), [#allocation4], 256   ;;  %p1420_p9 = pmov %p1419_p3 }
  0x4a   : > { %p1421_p8 = pmov %p1419_p3 }
  0x4b   : > { %1055 = vsyncadd (%p1420_p9), [#allocation4], 4294967040 }
  0x4c   : > { %1057 = dma.done.wait (%p1421_p8), [#allocation7], 512   ;;  %p1422_p7 = pmov %p1419_p3 }
  0x4d   : > { %s321_s1 = sand.u32 1, %s1176_s30   ;;  %s1280_s24 = sand.u32 1, %s1074_s25  }
  0x4e   : > { %1059 = vsyncadd (%p1422_p7), [#allocation7], 4294966784  ;;  %s779_s29 = sshll.u32 %s1280_s24, 6  ;;  %s322_s14 = scalar_lea.sflag [#allocation4], %s321_s1 }
  0x4f   : > { %s1283_s20 = scalar_lea.vmem [#allocation8], %s779_s29  ;;  %p1423_p12 = scmp.ne.s32.totalorder %s1409_s11, 0 }
  0x51   : > { %1061 = dma.done.wait (%p1423_p12), %s322_s14, 1024  }
  0x52   : > { %1063 = vsyncadd (%p1423_p12), %s322_s14, 4294966272  ;;  %s780_s15 = sshll.u32 %s1280_s24, 5  ;;  %s781_s17 = sshll.u32 %s1082_s27, 1 }
  0x53   : > { %p363_p2 = scmp.lt.s32.totalorder %s781_s17, 3  ;;  %s1297_s19 = scalar_lea.vmem [#allocation9], %s780_s15 }
  0x54   : > { %p782_p0 = scmp.ne.s32.totalorder %s1082_s27, 0 }
  0x55   : > { %s1438_s17 = smov (!%p363_p2, %s781_s17), 3 }
  0x56   : > { %s365_s21 = scalar_lea.vmem %s1395_s6, %s1438_s17  ;;  %372 = sbr.rel (%p782_p0) target bundleno = 630 (0x276), region = 64 }
  0x5b   : > { %v378_v0 = vld [vmem:[#allocation6 + $0x18] sm:$0xff]  ;;  %v377_v1 = vld [vmem:[#allocation6 + $0x10] sm:$0xff]  ;;  %vm386_vm0 = vcmask 261120   ;;  %v376_v3 = vld [vmem:[#allocation6 + $0x8] sm:$0xff] }
  0x5c   : > { %803 = vmatprep.subr.mxu0 %v378_v0  ;;  %v373_v2 = vld [vmem:[#allocation3] sm:$0xff]  ;;  %v375_v4 = vld [vmem:[#allocation6] sm:$0xff]  ;;  %v374_v5 = vld [vmem:[#allocation3 + $0x8] sm:$0xff] }
  0x5d   : > { %804 = vmatpush3.msra.mxu0 %v378_v0  ;;  %811 = vmatprep.mubr.msk.f32.mxu0 %vm386_vm0, %v373_v2  ;;  %v783_v6 = vld [vmem:[%s1391_s2] ss:$0 sm:$0xff] }
  0x5e   : > { %805 = vmatprep.subr.mxu0 %v377_v1  ;;  %v786_v40 = vld [vmem:[%s1392_s3] ss:$0 sm:$0xff] }
  0x5f   : > { %806 = vmatpush3.msra.mxu0 %v377_v1  ;;  %v787_v42 = vld [vmem:[%s1393_s4] ss:$0 sm:$0xff] }
  0x60   : > { %807 = vmatprep.subr.mxu0 %v376_v3 }
  0x61   : > { %808 = vmatpush3.msra.mxu0 %v376_v3 }
  0x62   : > { %809 = vmatprep.subr.mxu0 %v375_v4 }
  0x63   : > { %810 = vmatpush3.msra.mxu0 %v375_v4 }
  0x64   : > { %812 = vmatmul.mubr.msk.f32.vlgmr.msra.gmra.mxu0 %vm386_vm0, %v374_v5 }
 0x124   : > { %v813_v7 = vpop.f32.mrf.mxu0 }
 0x125   : > { %v465_v8 = vadd.f32 %v813_v7, %v783_v6 }
 0x126   : > { %v459_v9 = vpop.f32.mrf.mxu0 }
 0x127   : > { %v472_v10 = vmul.f32 0.70710677, %v465_v8  ;;  %v460_v11 = vadd.f32 %v783_v6, %v459_v9  ;;  %v469_v18 = vmul.f32 0.5, %v465_v8 }
 0x129   : > { %914 = verf.f32 %v472_v10  ;;  %v471_v12 = vmul.f32 0.70710677, %v460_v11  ;;  %v468_v15 = vmul.f32 0.5, %v460_v11 }
 0x12b   : > { %916 = verf.f32 %v471_v12 }
 0x136   : > { %v915_v13 = vpop.eup %914 }
 0x137   : > { %v476_v17 = vadd.f32 1.0, %v915_v13 }
 0x138   : > { %v917_v14 = vpop.eup %916 }
 0x139   : > { %v475_v16 = vadd.f32 1.0, %v917_v14  ;;  %v478_v21 = vmul.f32 %v476_v17, %v469_v18 }
 0x13b   : > { %v477_v19 = vmul.f32 %v475_v16, %v468_v15  ;;  %v482_v22 = vsel %vm386_vm0, %v478_v21, 0.0 }
 0x13d   : > { %v479_v20 = vsel %vm386_vm0, %v477_v19, 0.0 }
 0x13e   : > { %480 = vadd.xlane.f32.xlu0 %v479_v20 }
 0x142   : > { %483 = vadd.xlane.f32.xlu0 %v482_v22 }
 0x1c7   : > { %v481_v23 = vpop.xlane.xlu0 %480 }
 0x1c8   : > { %v486_v24 = vmul.f32 0.03125, %v481_v23 }
 0x1ca   : > { %v488_v25 = vsub.f32 %v477_v19, %v486_v24 }
 0x1cb   : > { %v484_v26 = vpop.xlane.xlu0 %483 }
 0x1cc   : > { %v487_v27 = vmul.f32 0.03125, %v484_v26  ;;  %v490_v28 = vmul.f32 %v488_v25, %v488_v25 }
 0x1ce   : > { %v489_v29 = vsub.f32 %v478_v21, %v487_v27  ;;  %v492_v30 = vsel %vm386_vm0, %v490_v28, 0.0 }
 0x1cf   : > { %493 = vadd.xlane.f32.xlu1 %v492_v30 }
 0x1d0   : > { %v491_v31 = vmul.f32 %v489_v29, %v489_v29 }
 0x1d2   : > { %v495_v32 = vsel %vm386_vm0, %v491_v31, 0.0 }
 0x1d3   : > { %496 = vadd.xlane.f32.xlu1 %v495_v32 }
 0x258   : > { %v494_v33 = vpop.xlane.xlu1 %493 }
 0x259   : > { %v498_v34 = vmul.f32 0.03125, %v494_v33 }
 0x25b   : > { %v501_v35 = vadd.f32 1e-12, %v498_v34 }
 0x25c   : > { %v497_v36 = vpop.xlane.xlu1 %496 }
 0x25d   : > { %918 = vrsqrt.f32 %v501_v35  ;;  %v499_v37 = vmul.f32 0.03125, %v497_v36 }
 0x25f   : > { %v502_v38 = vadd.f32 1e-12, %v499_v37 }
 0x261   : > { %920 = vrsqrt.f32 %v502_v38 }
 0x26a   : > { %v919_v39 = vpop.eup %918 }
 0x26b   : > { %v505_v41 = vmul.f32 %v919_v39, %v488_v25 }
 0x26d   : > { %v513_v43 = vmul.f32 %v786_v40, %v505_v41 }
 0x26e   : > { %v921_v44 = vpop.eup %920 }
 0x26f   : > { %v522_v45 = vadd.f32 %v787_v42, %v513_v43  ;;  %v506_v46 = vmul.f32 %v921_v44, %v489_v29 }
 0x271   : > { %524 = vst.msk [vmem:[#allocation2] sm:$0xff] %vm386_vm0, %v522_v45  ;;  %v514_v47 = vmul.f32 %v786_v40, %v506_v46 }
 0x273   : > { %v523_v48 = vadd.f32 %v787_v42, %v514_v47 }
 0x275   : > { %525 = vst.msk [vmem:[#allocation2 + $0x8] sm:$0xff] %vm386_vm0, %v523_v48 }
 0x276 PF: > { %v535_v49 = vld [vmem:[%s1283_s20 + $0x38] sm:$0xff]  ;;  %v534_v50 = vld [vmem:[%s1283_s20 + $0x30] sm:$0xff]  ;;  %v533_v51 = vld [vmem:[%s1283_s20 + $0x28] sm:$0xff]  ;;  %vm548_vm1 = vcmask 261120   ;;  %v1100_v59 = vmov 0.0   ;;  %v538_v60 = vlaneseq  ;;  %s796_s29 = sshll.u32 %s1082_s27, 8 }
 0x277   : > { %579 = vmatprep.subr.mxu0 %v535_v49  ;;  %814 = vmatprep.subr.mxu1 %v535_v49  ;;  %v532_v52 = vld [vmem:[%s1283_s20 + $0x20] sm:$0xff]  ;;  %v531_v53 = vld [vmem:[%s1283_s20 + $0x18] sm:$0xff]  ;;  %v530_v54 = vld [vmem:[%s1283_s20 + $0x10] sm:$0xff]  ;;  %s653_s14 = sshll.u32 %s1297_s19, 4  ;;  %s1335_s30 = scalar_lea.hbm %s1396_s7, %s796_s29  ;;  %s1337_s14 = int_to_ptr.vmem [resolvable:$true] %s653_s14 }
 0x278   : > { %580 = vmatpush1.msra.mxu0 %v534_v50  ;;  %818 = vmatpush1.msra.mxu1 %v534_v50  ;;  %v529_v55 = vld [vmem:[%s1283_s20 + $0x8] sm:$0xff]  ;;  %v528_v56 = vld [vmem:[%s1283_s20] sm:$0xff]  ;;  %v539_v61 = vshrl.u32 %v538_v60, 7  ;;  %s637_s27 = scalar_lea.sflag [#allocation5], %s1280_s24  ;;  %s1002_s17 = scalar_lea.vmem %s1337_s14, 512 }
 0x279   : > { %581 = vmatprep.subr.mxu0 %v533_v51  ;;  %815 = vmatprep.subr.mxu1 %v533_v51  ;;  %v526_v57 = vld [vmem:[#allocation2] sm:$0xff]  ;;  %p1003_p4 = scmp.ne.s32.totalorder %s1337_s14, %s1002_s17  ;;  %p1424_p6 = scmp.ne.s32.totalorder %s1410_s12, 0 }
 0x27a   : > { %582 = vmatpush1.msra.mxu0 %v532_v52  ;;  %819 = vmatpush1.msra.mxu1 %v532_v52  ;;  %v540_v62 = vsub.s32 0, %v539_v61  ;;  %v536_v63 = vld [vmem:[%s365_s21] sm:$0x3]  ;;  %v544_v0 = vsub.s32 1, %v539_v61  ;;  %s1101_s18 = smov [#allocation9]  }
 0x27b   : > { %583 = vmatprep.subr.mxu0 %v531_v53  ;;  %816 = vmatprep.subr.mxu1 %v531_v53  ;;  %p1004_p13 = pnand %p1003_p4, %p1424_p6  ;;  %s1006_s21 = sshll.u32 %s1101_s18, 4  ;;  %s1007_s21 = int_to_ptr.vmem [resolvable:$false] %s1006_s21 }
 0x27c   : > { %584 = vmatpush1.msra.mxu0 %v530_v54  ;;  %820 = vmatpush1.msra.mxu1 %v530_v54  ;;  %v527_v58 = vld [vmem:[#allocation2 + $0x8] sm:$0xff]  ;;  %v541_v1 = vrot.slane %v536_v63, %v540_v62  ;;  %v545_v2 = vrot.slane %v536_v63, %v544_v0  ;;  %s1008_s11 = scalar_lea.vmem %s1007_s21, 1024  ;;  %p1009_p1 = scmp.lt.s32.totalorder %s1337_s14, %s1007_s21 }
 0x27d   : > { %585 = vmatprep.subr.mxu0 %v529_v55  ;;  %817 = vmatprep.subr.mxu1 %v529_v55  ;;  %p1005_p5 = pneg %p1004_p13  ;;  %p1010_p10 = scmp.lt.s32.totalorder %s1008_s11, %s1002_s17 }
 0x27e   : > { %586 = vmatpush1.msra.mxu0 %v528_v56  ;;  %821 = vmatpush1.msra.mxu1 %v528_v56 }
 0x27f   : > { %619 = vmatprep.mubr.f32.mxu0 %v1100_v59  ;;  %625 = vmatprep.mubr.f32.mxu1 %v1100_v59  ;;  %p1011_p11 = por %p1010_p10, %p1009_p1 }
 0x280   : > { %788 = vmatmul.mubr.msk.f32.vlgmr.msra.gmra.mxu0 %vm548_vm1, %v526_v57  ;;  %789 = vmatmul.mubr.msk.f32.vlgmr.msra.gmra.mxu1 %vm548_vm1, %v527_v58 }
 0x281   : > { %p1012_p3 = pnand %p1011_p11, %p1005_p5 }
 0x340   : > { %v621_v3 = vpop.f32.mrf.mxu0  ;;  %v627_v4 = vpop.f32.mrf.mxu1 }
 0x341   : > { %v622_v5 = vadd.f32 %v621_v3, %v541_v1  ;;  %v628_v6 = vadd.f32 %v627_v4, %v541_v1 }
 0x342   : > { %v623_v7 = vpop.f32.mrf.mxu0  ;;  %v629_v8 = vpop.f32.mrf.mxu1 }
 0x343   : > { %632 = vst [vmem:[%s1297_s19] sm:$0xff] %v622_v5  ;;  %634 = vst [vmem:[%s1297_s19 + $0x10] sm:$0xff] %v628_v6  ;;  %v624_v9 = vadd.f32 %v623_v7, %v545_v2  ;;  %v630_v10 = vadd.f32 %v629_v8, %v545_v2 }
 0x345   : > { %633 = vst [vmem:[%s1297_s19 + $0x8] sm:$0xff] %v624_v9  ;;  %635 = vst [vmem:[%s1297_s19 + $0x18] sm:$0xff] %v630_v10 }
 0x346   : > { %1015 = shalt.err (!%p1012_p3)
}
 0x347   : > { %s1016_s19 = scalar_lea.hbm %s1335_s30, 512  ;;  %s1020_s9 = scalar_lea.hbm %s1396_s7, 1024 }
 0x348   : > { %p1017_p9 = scmp.ne.s32.totalorder %s1335_s30, %s1016_s19  ;;  %p1021_p12 = scmp.lt.s32.totalorder %s1335_s30, %s1396_s7 }
 0x349   : > { %p1022_p2 = scmp.lt.s32.totalorder %s1020_s9, %s1016_s19 }
 0x34a   : > { %p1018_p8 = pnand %p1017_p9, %p1424_p6 }
 0x34b   : > { %p1023_p0 = por %p1022_p2, %p1021_p12 }
 0x34c   : > { %p1019_p7 = pneg %p1018_p8 }
 0x34e   : > { %p1024_p4 = pnand %p1023_p0, %p1019_p7 }
 0x350   : > { %1027 = shalt.err (!%p1024_p4)
}
 0x351   : > { %s1102_s8 = smov 256   ;;  %s1103_s1 = smov 512  }
 0x352   : > { %s1104_s29 = smov 16  }
 0x353   : > { %832 = dma.vmem_to_hbm [thread:$0]  (%p1424_p6), %s1337_s14, 512, %s1335_s30, %s637_s27, %s1102_s8, %s1103_s1, %s1104_s29  }
 0x354 PF: > { %s1425_s20 = sld [smem:[#allocation14_spill]] }
 0x355   : > { %s1426_s15 = sld [smem:[#allocation16_spill]] }
 0x356   : > { %s1427_s17 = sld [smem:[#allocation15_spill]] }
 0x35a   : > { %s668_s18 = sand.u32 1, %s1425_s20  }
 0x35b   : > { %p1428_p13 = scmp.ne.s32.totalorder %s1426_s15, 0  ;;  %s669_s21 = scalar_lea.sflag [#allocation5], %s668_s18 }
 0x35c   : > { %p1429_p5 = scmp.ge.s32.totalorder %s1427_s17, 2 }
 0x35e   : > { %p846_p1 = pnand %p1429_p5, %p1428_p13 }
 0x360   : > { %p847_p10 = pneg %p846_p1 }
 0x362   : > { %1065 = dma.done.wait (%p847_p10), %s669_s21, 512  }
 0x363   : > { %1067 = vsyncadd (%p847_p10), %s669_s21, 4294966784  ;;  %s22_s29 = sadd.s32 1, %s1427_s17   ;;  %s1430_s24 = smov %s1074_s25 }
 0x364   : > { %p19_p11 = scmp.ge.s32.totalorder %s22_s29, 4   ;;  %s1431_s25 = smov %s1078_s26 }
 0x365   : > { %s1432_s26 = smov %s1261_s22  ;;  %s1433_s27 = smov %s1086_s28 }
 0x366   : > { %s1434_s28 = smov %s1436_s16  ;;  %21 = sbr.rel (!%p19_p11) target bundleno = 9 (0x9), region = 108 }
 0x36b   :  { %674 = vsyncpa [#allocation4], 1 }
 0x36c   :  { %676 = vsyncpa [#allocation4 + $0x1], 1 }
 0x36d   :  { %677 = vsyncpa [#allocation7], 1 }
 0x36e   :  { %678 = vsyncpa [#allocation5], 1 }
 0x36f   :  { %680 = vsyncpa [#allocation5 + $0x1], 1 }

</bundles_post_ra>
